<compile_context>
chip_gen: v6e
topology: v6e:2x2x1
jax: 0.10.0
libtpu: 0.0.40
codegen_flags: <defaults>
</compile_context>

<pallas_src>
import itertools
import numpy as np

import jax
import jax.numpy as jnp
from jax.experimental import pallas as pl
from jax.experimental.pallas import tpu as pltpu

ALPHA = 0.25
GAMMA = 2.0   # == 2 -> implemented as x*x (no pow/EUP)
EPS = 1e-8


def _round_up(x, m):
    return ((x + m - 1) // m) * m


def _recip(x):
    """Approx EUP reciprocal + one VPU Newton step (error ~1e-7 rel)."""
    r = pl.reciprocal(x, approx=True)
    return r * (2.0 - x * r)


def make_cost_kernel(cost_class_w: float, cost_bbox_w: float, cost_giou_w: float):
    """Pallas kernel computing one (TILE_M, TILE_T) tile of the cost matrix."""

    def kernel(logits_ref, onehot_ref, pb_ref, tb_ref, c_ref):
        pb = pb_ref[...]        # [TM, 16]: cx,cy,w,h, x0,y0,x1,y1, area, pad...
        tb = tb_ref[...]        # [16, TT]: same layout, transposed

        # ---- L1 cdist (cxcywh space), weight folded, written straight out ---
        cost_bbox = (jnp.abs(pb[:, 0:1] - tb[0:1, :])
                     + jnp.abs(pb[:, 1:2] - tb[1:2, :])
                     + jnp.abs(pb[:, 2:3] - tb[2:3, :])
                     + jnp.abs(pb[:, 3:4] - tb[3:4, :]))
        c_ref[...] = cost_bbox_w * cost_bbox

        # ---- focal classification cost (gather via one-hot matmul on MXU) ---
        p = jax.nn.sigmoid(logits_ref[...])                     # [TM, C]
        one_m_p = 1.0 - p
        neg = (1.0 - ALPHA) * (p * p) * (-jnp.log(one_m_p + EPS))
        pos = ALPHA * (one_m_p * one_m_p) * (-jnp.log(p + EPS))
        cls_delta = pos - neg                                   # [TM, C]
        c_ref[...] += cost_class_w * jnp.dot(
            cls_delta, onehot_ref[...], preferred_element_type=jnp.float32)

        # ---- generalized IoU cost -------------------------------------------
        o_x0 = pb[:, 4:5]; o_y0 = pb[:, 5:6]
        o_x1 = pb[:, 6:7]; o_y1 = pb[:, 7:8]
        area_o = pb[:, 8:9]                                     # [TM, 1]
        t_x0 = tb[4:5, :]; t_y0 = tb[5:6, :]
        t_x1 = tb[6:7, :]; t_y1 = tb[7:8, :]
        area_t = tb[8:9, :]                                     # [1, TT]

        inter_w = jnp.maximum(jnp.minimum(o_x1, t_x1) - jnp.maximum(o_x0, t_x0), 0.0)
        inter_h = jnp.maximum(jnp.minimum(o_y1, t_y1) - jnp.maximum(o_y0, t_y0), 0.0)
        inter = inter_w * inter_h                               # [TM, TT]
        union = area_o + area_t - inter
        enc = ((jnp.maximum(o_x1, t_x1) - jnp.minimum(o_x0, t_x0))
               * (jnp.maximum(o_y1, t_y1) - jnp.minimum(o_y0, t_y0)))

        iou = inter * _recip(union)
        giou = iou - (enc - union) * _recip(enc)
        c_ref[...] = c_ref[...] - cost_giou_w * giou

    return kernel


def _augment_boxes(boxes):
    """[M,4] cxcywh -> [M,9]: cx,cy,w,h, x0,y0,x1,y1, area."""
    cx, cy, w, h = boxes[:, 0], boxes[:, 1], boxes[:, 2], boxes[:, 3]
    x0 = cx - 0.5 * w
    y0 = cy - 0.5 * h
    x1 = cx + 0.5 * w
    y1 = cy + 0.5 * h
    area = (x1 - x0) * (y1 - y0)
    return jnp.stack([cx, cy, w, h, x0, y0, x1, y1, area], axis=-1)


def compute_cost_matrix(pred_logits, pred_boxes, tgt_ids, tgt_bbox,
                        cost_class=1.0, cost_bbox=1.0, cost_giou=1.0):
    """Returns the cost matrix C of shape [B*Q, T] (float32)."""
    bs, nq, nc = pred_logits.shape
    N = bs * nq
    T = int(tgt_bbox.shape[0])

    # Tile sizes: bounded working set, lane-dense output, VMEM-safe on v7x.
    TILE_M = min(256, _round_up(N, 8))
    Npad = _round_up(N, TILE_M)
    TILE_T = min(512, _round_up(T, 128))
    Tpad = _round_up(T, TILE_T)

    logits = pred_logits.reshape(N, nc).astype(jnp.float32)
    pbox = pred_boxes.reshape(N, 4).astype(jnp.float32)
    tbox = tgt_bbox.astype(jnp.float32)

    dummy = jnp.array([0.5, 0.5, 0.2, 0.2], jnp.float32)   # valid box: no div-by-0
    if Npad != N:
        logits = jnp.pad(logits, ((0, Npad - N), (0, 0)))
        pbox = jnp.concatenate([pbox, jnp.tile(dummy[None], (Npad - N, 1))], 0)
    if Tpad != T:
        tbox = jnp.concatenate([tbox, jnp.tile(dummy[None], (Tpad - T, 1))], 0)

    onehot = jax.nn.one_hot(tgt_ids, nc, dtype=jnp.float32).T      # [C, T]
    if Tpad != T:
        onehot = jnp.pad(onehot, ((0, 0), (0, Tpad - T)))

    # Hoisted per-row / per-column geometry (cxcywh, xyxy, area), padded to 16.
    pb = _augment_boxes(pbox)                                      # [Npad, 9]
    pb = jnp.pad(pb, ((0, 0), (0, 16 - pb.shape[1])))              # [Npad, 16]
    tb = _augment_boxes(tbox).T                                    # [9, Tpad]
    tb = jnp.pad(tb, ((0, 16 - tb.shape[0]), (0, 0)))              # [16, Tpad]

    kernel = make_cost_kernel(float(cost_class), float(cost_bbox), float(cost_giou))

    c_full = pl.pallas_call(
        kernel,
        out_shape=jax.ShapeDtypeStruct((Npad, Tpad), jnp.float32),
        grid=(Npad // TILE_M, Tpad // TILE_T),
        in_specs=[
            pl.BlockSpec((TILE_M, nc), lambda i, j: (i, 0)),
            pl.BlockSpec((nc, TILE_T), lambda i, j: (0, j)),
            pl.BlockSpec((TILE_M, 16), lambda i, j: (i, 0)),
            pl.BlockSpec((16, TILE_T), lambda i, j: (0, j)),
        ],
        out_specs=pl.BlockSpec((TILE_M, TILE_T), lambda i, j: (i, j)),
        compiler_params=pltpu.CompilerParams(
            dimension_semantics=("parallel", "parallel")),
    )(logits, onehot, pb, tb)

    return c_full[:N, :T]


def _lsa_bruteforce(cost):
    """Exact linear-sum-assignment for tiny rectangular matrices (rows >= cols)."""
    n_rows, n_cols = cost.shape
    best_perm, best_cost = None, np.inf
    for perm in itertools.permutations(range(n_rows), n_cols):
        c = cost[list(perm), range(n_cols)].sum()
        if c < best_cost:
            best_cost, best_perm = c, perm
    rows = np.asarray(best_perm, dtype=np.int64)
    cols = np.arange(n_cols, dtype=np.int64)
    order = np.argsort(rows)
    return rows[order], cols[order]


def hungarian_matcher_forward(outputs, targets, cost_class=1.0, cost_bbox=1.0,
                              cost_giou=1.0, upretrain=False, encoder=False):
    """JAX/Pallas re-implementation of HungarianMatcher.forward (cost_bbox_type='l1')."""
    pred_logits = outputs["pred_logits"]
    pred_boxes = outputs["pred_boxes"]
    bs, nq, _ = pred_logits.shape

    tgt_ids = jnp.concatenate([t["labels"] for t in targets]).astype(jnp.int32)
    tgt_bbox = jnp.concatenate([t["boxes"] for t in targets], axis=0)
    if (not upretrain) and (encoder is False):
        tgt_ids = jnp.ones_like(tgt_ids)   # tgt_ids.fill_(1)

    C = compute_cost_matrix(pred_logits, pred_boxes, tgt_ids, tgt_bbox,
                            cost_class=cost_class, cost_bbox=cost_bbox,
                            cost_giou=cost_giou)
    C = jax.block_until_ready(C)
    C_np = np.asarray(C).reshape(bs, nq, -1)

    sizes = [int(t["boxes"].shape[0]) for t in targets]
    indices = []
    offset = 0
    for i, sz in enumerate(sizes):
        sub = C_np[i, :, offset:offset + sz]
        indices.append(_lsa_bruteforce(sub))
        offset += sz
    return indices, C_np


def _reference_cost(pred_logits, pred_boxes, tgt_ids, tgt_bbox, cw, bw, gw):
    """Pure numpy reference of the cost matrix (mirrors the torch code)."""
    nc = pred_logits.shape[-1]
    logits = np.asarray(pred_logits, np.float64).reshape(-1, nc)
    p = 1.0 / (1.0 + np.exp(-logits))
    neg = (1 - ALPHA) * p ** GAMMA * (-np.log(1 - p + EPS))
    pos = ALPHA * (1 - p) ** GAMMA * (-np.log(p + EPS))
    cost_class = pos[:, tgt_ids] - neg[:, tgt_ids]

    ob = np.asarray(pred_boxes, np.float64).reshape(-1, 4)
    tb = np.asarray(tgt_bbox, np.float64)
    cost_bbox = np.abs(ob[:, None, :] - tb[None, :, :]).sum(-1)

    def to_xyxy(b):
        return np.stack([b[:, 0] - b[:, 2] / 2, b[:, 1] - b[:, 3] / 2,
                         b[:, 0] + b[:, 2] / 2, b[:, 1] + b[:, 3] / 2], -1)

    a, b = to_xyxy(ob), to_xyxy(tb)
    area_a = (a[:, 2] - a[:, 0]) * (a[:, 3] - a[:, 1])
    area_b = (b[:, 2] - b[:, 0]) * (b[:, 3] - b[:, 1])
    lt = np.maximum(a[:, None, :2], b[None, :, :2])
    rb = np.minimum(a[:, None, 2:], b[None, :, 2:])
    wh = np.clip(rb - lt, 0, None)
    inter = wh[..., 0] * wh[..., 1]
    union = area_a[:, None] + area_b[None, :] - inter
    iou = inter / union
    lt2 = np.minimum(a[:, None, :2], b[None, :, :2])
    rb2 = np.maximum(a[:, None, 2:], b[None, :, 2:])
    wh2 = np.clip(rb2 - lt2, 0, None)
    enc = wh2[..., 0] * wh2[..., 1]
    giou = iou - (enc - union) / enc
    return bw * cost_bbox + cw * cost_class + gw * (-giou)


if __name__ == "__main__":
    key = jax.random.PRNGKey(0)
    bs, num_queries, num_classes = 2, 8, 4
    sizes = [2, 3]  # ground-truth boxes per batch element

    k1, k2, k3 = jax.random.split(key, 3)
    pred_logits = jax.random.normal(k1, (bs, num_queries, num_classes), jnp.float32)
    pred_boxes = jax.random.uniform(k2, (bs, num_queries, 4), jnp.float32,
                                    minval=0.2, maxval=0.4)  # cxcywh, valid

    targets = []
    tkeys = jax.random.split(k3, len(sizes) * 2)
    for i, sz in enumerate(sizes):
        cxcy = jax.random.uniform(tkeys[2 * i], (sz, 2), jnp.float32, 0.3, 0.7)
        wh = jax.random.uniform(tkeys[2 * i + 1], (sz, 2), jnp.float32, 0.1, 0.3)
        targets.append({
            "labels": jnp.zeros((sz,), jnp.int32),     # overwritten by fill_(1) path
            "boxes": jnp.concatenate([cxcy, wh], axis=-1),
        })

    outputs = {"pred_logits": pred_logits, "pred_boxes": pred_boxes}
    indices, C_np = hungarian_matcher_forward(
        outputs, targets, cost_class=1.0, cost_bbox=1.0, cost_giou=1.0)

    # correctness check of the Pallas-computed cost matrix against numpy
    tgt_ids_np = np.ones(sum(sizes), dtype=np.int64)   # fill_(1) semantics
    tgt_bbox_np = np.concatenate([np.asarray(t["boxes"]) for t in targets], 0)
    C_ref = _reference_cost(np.asarray(pred_logits), np.asarray(pred_boxes),
                            tgt_ids_np, tgt_bbox_np, 1.0, 1.0, 1.0)
    C_ref = C_ref.reshape(bs, num_queries, -1)
    assert np.allclose(C_np, C_ref, rtol=1e-4, atol=1e-4), "cost matrix mismatch"

    # sanity on assignment sizes: len(index_i) = len(index_j) = min(Q, n_targets)
    for (ri, ci), sz in zip(indices, sizes):
        assert len(ri) == len(ci) == min(num_queries, sz)

    print("KERNEL_OK")
</pallas_src>

<mosaic_0001>
module attributes {stable_mosaic.version = 11 : i64} {
  func.func @kernel(%arg0: i32, %arg1: i32, %arg2: memref<16x4xf32, #tpu.memory_space<vmem>>, %arg3: memref<4x128xf32, #tpu.memory_space<vmem>>, %arg4: memref<16x16xf32, #tpu.memory_space<vmem>>, %arg5: memref<16x128xf32, #tpu.memory_space<vmem>>, %arg6: memref<16x128xf32, #tpu.memory_space<vmem>>) attributes {dimension_semantics = [#tpu.dimension_semantics<parallel>, #tpu.dimension_semantics<parallel>], iteration_bounds = array<i64: 1, 1>, scalar_prefetch = 0 : i64, scratch_operands = 0 : i64, tpu.core_type = #tpu.core_type<tc>, window_params = [{transform_indices = @transform_0, window_bounds = array<i64: 16, 4>}, {transform_indices = @transform_1, window_bounds = array<i64: 4, 128>}, {transform_indices = @transform_2, window_bounds = array<i64: 16, 16>}, {transform_indices = @transform_3, window_bounds = array<i64: 16, 128>}, {transform_indices = @transform_4, window_bounds = array<i64: 16, 128>}]} {
    %c0 = arith.constant 0 : index
    %c0_0 = arith.constant 0 : index
    %0 = vector.load %arg4[%c0, %c0_0] : memref<16x16xf32, #tpu.memory_space<vmem>>, vector<16x16xf32>
    %c0_1 = arith.constant 0 : index
    %c0_2 = arith.constant 0 : index
    %1 = vector.load %arg5[%c0_1, %c0_2] : memref<16x128xf32, #tpu.memory_space<vmem>>, vector<16x128xf32>
    %2 = vector.extract_strided_slice %0 {offsets = [0, 0], sizes = [16, 1], strides = [1, 1]} : vector<16x16xf32> to vector<16x1xf32>
    %3 = vector.extract_strided_slice %1 {offsets = [0, 0], sizes = [1, 128], strides = [1, 1]} : vector<16x128xf32> to vector<1x128xf32>
    %4 = vector.broadcast %2 : vector<16x1xf32> to vector<16x128xf32>
    %5 = vector.broadcast %3 : vector<1x128xf32> to vector<16x128xf32>
    %6 = arith.subf %4, %5 : vector<16x128xf32>
    %7 = math.absf %6 : vector<16x128xf32>
    %8 = vector.extract_strided_slice %0 {offsets = [0, 1], sizes = [16, 1], strides = [1, 1]} : vector<16x16xf32> to vector<16x1xf32>
    %9 = vector.extract_strided_slice %1 {offsets = [1, 0], sizes = [1, 128], strides = [1, 1]} : vector<16x128xf32> to vector<1x128xf32>
    %10 = vector.broadcast %8 : vector<16x1xf32> to vector<16x128xf32>
    %11 = vector.broadcast %9 : vector<1x128xf32> to vector<16x128xf32>
    %12 = arith.subf %10, %11 : vector<16x128xf32>
    %13 = math.absf %12 : vector<16x128xf32>
    %14 = arith.addf %7, %13 : vector<16x128xf32>
    %15 = vector.extract_strided_slice %0 {offsets = [0, 2], sizes = [16, 1], strides = [1, 1]} : vector<16x16xf32> to vector<16x1xf32>
    %16 = vector.extract_strided_slice %1 {offsets = [2, 0], sizes = [1, 128], strides = [1, 1]} : vector<16x128xf32> to vector<1x128xf32>
    %17 = vector.broadcast %15 : vector<16x1xf32> to vector<16x128xf32>
    %18 = vector.broadcast %16 : vector<1x128xf32> to vector<16x128xf32>
    %19 = arith.subf %17, %18 : vector<16x128xf32>
    %20 = math.absf %19 : vector<16x128xf32>
    %21 = arith.addf %14, %20 : vector<16x128xf32>
    %22 = vector.extract_strided_slice %0 {offsets = [0, 3], sizes = [16, 1], strides = [1, 1]} : vector<16x16xf32> to vector<16x1xf32>
    %23 = vector.extract_strided_slice %1 {offsets = [3, 0], sizes = [1, 128], strides = [1, 1]} : vector<16x128xf32> to vector<1x128xf32>
    %24 = vector.broadcast %22 : vector<16x1xf32> to vector<16x128xf32>
    %25 = vector.broadcast %23 : vector<1x128xf32> to vector<16x128xf32>
    %26 = arith.subf %24, %25 : vector<16x128xf32>
    %27 = math.absf %26 : vector<16x128xf32>
    %28 = arith.addf %21, %27 : vector<16x128xf32>
    %cst = arith.constant 1.000000e+00 : f32
    %29 = vector.broadcast %cst : f32 to vector<16x128xf32>
    %30 = arith.mulf %29, %28 : vector<16x128xf32>
    %c0_3 = arith.constant 0 : index
    %c0_4 = arith.constant 0 : index
    %31 = vector.load %arg6[%c0_3, %c0_4] : memref<16x128xf32, #tpu.memory_space<vmem>>, vector<16x128xf32>
    tpu.vector_store %arg6[%c0_3, %c0_4], %30 {strides = array<i32>} : memref<16x128xf32, #tpu.memory_space<vmem>>, vector<16x128xf32>,
    %c0_5 = arith.constant 0 : index
    %c0_6 = arith.constant 0 : index
    %32 = vector.load %arg2[%c0_5, %c0_6] : memref<16x4xf32, #tpu.memory_space<vmem>>, vector<16x4xf32>
    %33 = arith.negf %32 : vector<16x4xf32>
    %34 = math.exp %33 : vector<16x4xf32>
    %cst_7 = arith.constant 1.000000e+00 : f32
    %35 = vector.broadcast %cst_7 : f32 to vector<16x4xf32>
    %36 = arith.addf %35, %34 : vector<16x4xf32>
    %37 = arith.divf %35, %36 : vector<16x4xf32>
    %cst_8 = arith.constant 1.000000e+00 : f32
    %38 = vector.broadcast %cst_8 : f32 to vector<16x4xf32>
    %39 = arith.subf %38, %37 : vector<16x4xf32>
    %40 = arith.mulf %37, %37 : vector<16x4xf32>
    %cst_9 = arith.constant 7.500000e-01 : f32
    %41 = vector.broadcast %cst_9 : f32 to vector<16x4xf32>
    %42 = arith.mulf %41, %40 : vector<16x4xf32>
    %cst_10 = arith.constant 9.99999993E-9 : f32
    %43 = vector.broadcast %cst_10 : f32 to vector<16x4xf32>
    %44 = arith.addf %39, %43 : vector<16x4xf32>
    %45 = math.log %44 : vector<16x4xf32>
    %cst_11 = arith.constant 0.000000e+00 : f32
    %46 = vector.broadcast %cst_11 : f32 to vector<16x4xf32>
    %47 = arith.subf %46, %45 : vector<16x4xf32>
    %48 = arith.mulf %42, %47 : vector<16x4xf32>
    %49 = arith.mulf %39, %39 : vector<16x4xf32>
    %cst_12 = arith.constant 2.500000e-01 : f32
    %50 = vector.broadcast %cst_12 : f32 to vector<16x4xf32>
    %51 = arith.mulf %50, %49 : vector<16x4xf32>
    %cst_13 = arith.constant 9.99999993E-9 : f32
    %52 = vector.broadcast %cst_13 : f32 to vector<16x4xf32>
    %53 = arith.addf %37, %52 : vector<16x4xf32>
    %54 = math.log %53 : vector<16x4xf32>
    %cst_14 = arith.constant 0.000000e+00 : f32
    %55 = vector.broadcast %cst_14 : f32 to vector<16x4xf32>
    %56 = arith.subf %55, %54 : vector<16x4xf32>
    %57 = arith.mulf %51, %56 : vector<16x4xf32>
    %58 = arith.subf %57, %48 : vector<16x4xf32>
    %c0_15 = arith.constant 0 : index
    %c0_16 = arith.constant 0 : index
    %59 = vector.load %arg6[%c0_15, %c0_16] : memref<16x128xf32, #tpu.memory_space<vmem>>, vector<16x128xf32>
    %c0_17 = arith.constant 0 : index
    %c0_18 = arith.constant 0 : index
    %60 = vector.load %arg3[%c0_17, %c0_18] : memref<4x128xf32, #tpu.memory_space<vmem>>, vector<4x128xf32>
    %cst_19 = arith.constant dense<0.000000e+00> : vector<16x128xf32>
    %61 = tpu.matmul %58, %60, %cst_19 {dimension_numbers = #tpu.dot_dimension_numbers<[1], [0], [0], [1], [0, 0, 1, 1], [], []>} : vector<16x4xf32>, vector<4x128xf32>, vector<16x128xf32> -> vector<16x128xf32>
    %cst_20 = arith.constant 1.000000e+00 : f32
    %62 = vector.broadcast %cst_20 : f32 to vector<16x128xf32>
    %63 = arith.mulf %62, %61 : vector<16x128xf32>
    %64 = arith.addf %59, %63 : vector<16x128xf32>
    %c0_21 = arith.constant 0 : index
    %c0_22 = arith.constant 0 : index
    %65 = vector.load %arg6[%c0_21, %c0_22] : memref<16x128xf32, #tpu.memory_space<vmem>>, vector<16x128xf32>
    tpu.vector_store %arg6[%c0_21, %c0_22], %64 {strides = array<i32>} : memref<16x128xf32, #tpu.memory_space<vmem>>, vector<16x128xf32>,
    %66 = vector.extract_strided_slice %0 {offsets = [0, 4], sizes = [16, 1], strides = [1, 1]} : vector<16x16xf32> to vector<16x1xf32>
    %67 = vector.extract_strided_slice %0 {offsets = [0, 5], sizes = [16, 1], strides = [1, 1]} : vector<16x16xf32> to vector<16x1xf32>
    %68 = vector.extract_strided_slice %0 {offsets = [0, 6], sizes = [16, 1], strides = [1, 1]} : vector<16x16xf32> to vector<16x1xf32>
    %69 = vector.extract_strided_slice %0 {offsets = [0, 7], sizes = [16, 1], strides = [1, 1]} : vector<16x16xf32> to vector<16x1xf32>
    %70 = vector.extract_strided_slice %0 {offsets = [0, 8], sizes = [16, 1], strides = [1, 1]} : vector<16x16xf32> to vector<16x1xf32>
    %71 = vector.extract_strided_slice %1 {offsets = [4, 0], sizes = [1, 128], strides = [1, 1]} : vector<16x128xf32> to vector<1x128xf32>
    %72 = vector.extract_strided_slice %1 {offsets = [5, 0], sizes = [1, 128], strides = [1, 1]} : vector<16x128xf32> to vector<1x128xf32>
    %73 = vector.extract_strided_slice %1 {offsets = [6, 0], sizes = [1, 128], strides = [1, 1]} : vector<16x128xf32> to vector<1x128xf32>
    %74 = vector.extract_strided_slice %1 {offsets = [7, 0], sizes = [1, 128], strides = [1, 1]} : vector<16x128xf32> to vector<1x128xf32>
    %75 = vector.extract_strided_slice %1 {offsets = [8, 0], sizes = [1, 128], strides = [1, 1]} : vector<16x128xf32> to vector<1x128xf32>
    %76 = vector.broadcast %68 : vector<16x1xf32> to vector<16x128xf32>
    %77 = vector.broadcast %73 : vector<1x128xf32> to vector<16x128xf32>
    %78 = arith.minimumf %76, %77 : vector<16x128xf32>
    %79 = vector.broadcast %66 : vector<16x1xf32> to vector<16x128xf32>
    %80 = vector.broadcast %71 : vector<1x128xf32> to vector<16x128xf32>
    %81 = arith.maximumf %79, %80 : vector<16x128xf32>
    %82 = arith.subf %78, %81 : vector<16x128xf32>
    %cst_23 = arith.constant 0.000000e+00 : f32
    %83 = vector.broadcast %cst_23 : f32 to vector<16x128xf32>
    %84 = arith.maximumf %82, %83 : vector<16x128xf32>
    %85 = vector.broadcast %69 : vector<16x1xf32> to vector<16x128xf32>
    %86 = vector.broadcast %74 : vector<1x128xf32> to vector<16x128xf32>
    %87 = arith.minimumf %85, %86 : vector<16x128xf32>
    %88 = vector.broadcast %67 : vector<16x1xf32> to vector<16x128xf32>
    %89 = vector.broadcast %72 : vector<1x128xf32> to vector<16x128xf32>
    %90 = arith.maximumf %88, %89 : vector<16x128xf32>
    %91 = arith.subf %87, %90 : vector<16x128xf32>
    %cst_24 = arith.constant 0.000000e+00 : f32
    %92 = vector.broadcast %cst_24 : f32 to vector<16x128xf32>
    %93 = arith.maximumf %91, %92 : vector<16x128xf32>
    %94 = arith.mulf %84, %93 : vector<16x128xf32>
    %95 = vector.broadcast %70 : vector<16x1xf32> to vector<16x128xf32>
    %96 = vector.broadcast %75 : vector<1x128xf32> to vector<16x128xf32>
    %97 = arith.addf %95, %96 : vector<16x128xf32>
    %98 = arith.subf %97, %94 : vector<16x128xf32>
    %99 = vector.broadcast %68 : vector<16x1xf32> to vector<16x128xf32>
    %100 = vector.broadcast %73 : vector<1x128xf32> to vector<16x128xf32>
    %101 = arith.maximumf %99, %100 : vector<16x128xf32>
    %102 = vector.broadcast %66 : vector<16x1xf32> to vector<16x128xf32>
    %103 = vector.broadcast %71 : vector<1x128xf32> to vector<16x128xf32>
    %104 = arith.minimumf %102, %103 : vector<16x128xf32>
    %105 = arith.subf %101, %104 : vector<16x128xf32>
    %106 = vector.broadcast %69 : vector<16x1xf32> to vector<16x128xf32>
    %107 = vector.broadcast %74 : vector<1x128xf32> to vector<16x128xf32>
    %108 = arith.maximumf %106, %107 : vector<16x128xf32>
    %109 = vector.broadcast %67 : vector<16x1xf32> to vector<16x128xf32>
    %110 = vector.broadcast %72 : vector<1x128xf32> to vector<16x128xf32>
    %111 = arith.minimumf %109, %110 : vector<16x128xf32>
    %112 = arith.subf %108, %111 : vector<16x128xf32>
    %113 = arith.mulf %105, %112 : vector<16x128xf32>
    %114 = tpu.reciprocal %98 {approx = true} : vector<16x128xf32> -> vector<16x128xf32>
    %115 = arith.mulf %98, %114 : vector<16x128xf32>
    %cst_25 = arith.constant 2.000000e+00 : f32
    %116 = vector.broadcast %cst_25 : f32 to vector<16x128xf32>
    %117 = arith.subf %116, %115 : vector<16x128xf32>
    %118 = arith.mulf %114, %117 : vector<16x128xf32>
    %119 = arith.mulf %94, %118 : vector<16x128xf32>
    %120 = arith.subf %113, %98 : vector<16x128xf32>
    %121 = tpu.reciprocal %113 {approx = true} : vector<16x128xf32> -> vector<16x128xf32>
    %122 = arith.mulf %113, %121 : vector<16x128xf32>
    %cst_26 = arith.constant 2.000000e+00 : f32
    %123 = vector.broadcast %cst_26 : f32 to vector<16x128xf32>
    %124 = arith.subf %123, %122 : vector<16x128xf32>
    %125 = arith.mulf %121, %124 : vector<16x128xf32>
    %126 = arith.mulf %120, %125 : vector<16x128xf32>
    %127 = arith.subf %119, %126 : vector<16x128xf32>
    %c0_27 = arith.constant 0 : index
    %c0_28 = arith.constant 0 : index
    %128 = vector.load %arg6[%c0_27, %c0_28] : memref<16x128xf32, #tpu.memory_space<vmem>>, vector<16x128xf32>
    %cst_29 = arith.constant 1.000000e+00 : f32
    %129 = vector.broadcast %cst_29 : f32 to vector<16x128xf32>
    %130 = arith.mulf %129, %127 : vector<16x128xf32>
    %131 = arith.subf %128, %130 : vector<16x128xf32>
    %c0_30 = arith.constant 0 : index
    %c0_31 = arith.constant 0 : index
    %132 = vector.load %arg6[%c0_30, %c0_31] : memref<16x128xf32, #tpu.memory_space<vmem>>, vector<16x128xf32>
    tpu.vector_store %arg6[%c0_30, %c0_31], %131 {strides = array<i32>} : memref<16x128xf32, #tpu.memory_space<vmem>>, vector<16x128xf32>,
    return
  }
  func.func @transform_0(%arg0: i32, %arg1: i32) -> (i32, i32) {
    %c0_i32 = arith.constant 0 : i32
    %c0_i32_0 = arith.constant 0 : i32
    return %arg0, %c0_i32 : i32, i32
  }
  func.func @transform_1(%arg0: i32, %arg1: i32) -> (i32, i32) {
    %c0_i32 = arith.constant 0 : i32
    %c0_i32_0 = arith.constant 0 : i32
    return %c0_i32, %arg1 : i32, i32
  }
  func.func @transform_2(%arg0: i32, %arg1: i32) -> (i32, i32) {
    %c0_i32 = arith.constant 0 : i32
    %c0_i32_0 = arith.constant 0 : i32
    return %arg0, %c0_i32 : i32, i32
  }
  func.func @transform_3(%arg0: i32, %arg1: i32) -> (i32, i32) {
    %c0_i32 = arith.constant 0 : i32
    %c0_i32_0 = arith.constant 0 : i32
    return %c0_i32, %arg1 : i32, i32
  }
  func.func @transform_4(%arg0: i32, %arg1: i32) -> (i32, i32) {
    %c0_i32 = arith.constant 0 : i32
    return %arg0, %arg1 : i32, i32
  }
}

</mosaic_0001>

<bundles_post_ra>
// kernel: tpu_custom_call.1
= control target key start
LH: loop header
LB: loop body
LE: loop exit
PB: predicated region body
PF: predicated region fallthrough
CT: control target
= control target key end

     0   :  { %9 = vsyncpa [#allocation3], 0  ;;  %s606_s0 = inlined_call_operand.vmem [shape: f32[16,4], index: 0, kind: input, shape index: {}]   ;;  %s607_s1 = inlined_call_operand.vmem [shape: f32[4,128], index: 1, kind: input, shape index: {}]   ;;  %s608_s2 = inlined_call_operand.vmem [shape: f32[16,16], index: 2, kind: input, shape index: {}]   ;;  %s609_s3 = inlined_call_operand.hbm [shape: f32[16,128], index: 3, kind: input, shape index: {}]   ;;  %s610_s4 = inlined_call_operand.hbm [shape: f32[16,128], index: 4, kind: output, shape index: {}]  }
   0x1   :  { %10 = vsyncpa [#allocation4], 0  ;;  %s501_s15 = smov [#allocation2]  }
   0x2   :  { %s22_s16 = sshll.u32 %s501_s15, 4  ;;  %s23_s16 = int_to_ptr.vmem [resolvable:$true] %s22_s16 }
   0x3   :  { %s465_s17 = scalar_lea.vmem %s23_s16, 256  ;;  %p470_p1 = scmp.lt.s32.totalorder %s23_s16, %s23_s16 }
   0x4   :  { %p466_p0 = scmp.ne.s32.totalorder %s23_s16, %s465_s17  ;;  %p471_p2 = scmp.lt.s32.totalorder %s465_s17, %s465_s17 }
   0x6   :  { %p472_p3 = por %p471_p2, %p470_p1 }
   0x8   :  { %p473_p4 = pnand %p472_p3, %p466_p0 }
   0xa   :  { %476 = shalt.err (!%p473_p4)
}
   0xb   :  { %s502_s18 = smov 128   ;;  %s503_s19 = smov 8  }
   0xc   :  { %28 = dma.hbm_to_vmem [thread:$0]  %s609_s3, 256, %s23_s16, [#allocation3], %s502_s18, %s502_s18, %s503_s19  }
   0xd   :  { %497 = dma.done.wait [#allocation3], 256  }
   0xe   :  { %498 = vsyncadd [#allocation3], 4294967040  ;;  %v504_v0 = vmov 4   ;;  %v505_v1 = vmov 6   ;;  %vm166_vm0 = vcmask 1043456   ;;  %v32_v2 = vld [vmem:[%s608_s2] sm:$0xff]  ;;  %v46_v58 = vlaneseq }
   0xf   :  { %419 = vset.pattern.permute.xlu1 %v504_v0  ;;  %418 = vset.pattern.permute.xlu0 %v505_v1  ;;  %v158_v3 = vld [vmem:[%s607_s1] sm:$0xf]  ;;  %v111_v5 = vld [vmem:[%s606_s0 + $0x8] sm:$0xff]  ;;  %v506_v9 = vmov 7   ;;  %v507_v10 = vmov 5   ;;  %v508_v14 = vmov 0  }
  0x10   :  { %264 = vperm.xlu1 %419, %v32_v2   ;;  %250 = vperm.xlu0 %418, %v32_v2   ;;  %v110_v4 = vld [vmem:[%s606_s0] sm:$0xff]  ;;  %v560_v6 = vld [vmem:[%s608_s2 + $0x8] sm:$0xff]  ;;  %v393_v8 = vmul.f32 -1.442695, %v111_v5  ;;  %v509_v15 = vmov 1   ;;  %v510_v17 = vmov 8  }
  0x11   :  { %400 = vmatprep.subr.msk.mxu0 %vm166_vm0, %v158_v3  ;;  %v392_v7 = vmul.f32 -1.442695, %v110_v4  ;;  %v511_v18 = vmov 3   ;;  %v512_v27 = vmov 2   ;;  %vm159_vm1 = vcmask 31744   ;;  %s513_s0 = smov [#allocation5]  }
  0x12   :  { %401 = vmatpush3.msk.msra.mxu0 %vm166_vm0, %v158_v3  ;;  %v571_v61 = vshrl.u32 %v46_v58, 7  ;;  %v577_v3 = vld [vmem:[#allocation2] sm:$0xff]  ;;  %s380_s1 = sshll.u32 %s513_s0, 4  ;;  %s381_s1 = int_to_ptr.vmem [resolvable:$true] %s380_s1 }
  0x13   :  { %433 = vpow2.f32 %v392_v7  ;;  %s477_s2 = scalar_lea.vmem %s381_s1, 256  ;;  %p482_p6 = scmp.lt.s32.totalorder %s381_s1, %s381_s1 }
  0x14   :  { %268 = vperm.xlu1 %419, %v560_v6   ;;  %254 = vperm.xlu0 %418, %v560_v6   ;;  %435 = vpow2.f32 %v393_v8  ;;  %v273_v63 = vsub.s32 4, %v571_v61  ;;  %v291_v0 = vsub.s32 7, %v571_v61  ;;  %v259_v1 = vsub.s32 6, %v571_v61  ;;  %p478_p5 = scmp.ne.s32.totalorder %s381_s1, %s477_s2  ;;  %p483_p7 = scmp.lt.s32.totalorder %s477_s2, %s477_s2 }
  0x15   :  { %v82_v58 = vsub.s32 2, %v571_v61 }
  0x16   :  { %v274_v5 = vrot.slane %v577_v3, %v273_v63  ;;  %v260_v7 = vrot.slane %v577_v3, %v259_v1  ;;  %p484_p8 = por %p483_p7, %p482_p6 }
  0x18   :  { %421 = vset.pattern.permute.xlu1 %v506_v9  ;;  %420 = vset.pattern.permute.xlu0 %v506_v9  ;;  %p485_p9 = pnand %p484_p8, %p478_p5 }
  0x19   :  { %286 = vperm.xlu1 %421, %v560_v6   ;;  %282 = vperm.xlu0 %420, %v32_v2  }
  0x1d   :  { %422 = vset.pattern.permute.xlu1 %v507_v10  ;;  %423 = vset.pattern.permute.xlu0 %v507_v10 }
  0x1e   :  { %296 = vperm.xlu1 %422, %v32_v2   ;;  %300 = vperm.xlu0 %423, %v560_v6  }
  0x20   :  { %v434_v11 = vpop.eup %433 }
  0x21   :  { %v436_v12 = vpop.eup %435  ;;  %v118_v13 = vadd.f32 1.0, %v434_v11 }
  0x22   :  { %424 = vset.pattern.permute.xlu1 %v508_v14  ;;  %425 = vset.pattern.permute.xlu0 %v509_v15  ;;  %v119_v16 = vadd.f32 1.0, %v436_v12 }
  0x23   :  { %38 = vperm.xlu1 %424, %v32_v2   ;;  %55 = vperm.xlu0 %425, %v32_v2   ;;  %437 = vrcp.f32 %v118_v13 }
  0x24   :  { %439 = vrcp.f32 %v119_v16 }
  0x27   :  { %43 = vperm.xlu1 %424, %v560_v6   ;;  %428 = vset.pattern.permute.xlu0 %v510_v17 }
  0x28   :  { %320 = vperm.xlu0 %428, %v560_v6  }
  0x2b   :  { %426 = vset.pattern.permute.xlu1 %v509_v15 }
  0x2c   :  { %59 = vperm.xlu1 %426, %v560_v6   ;;  %430 = vset.pattern.permute.xlu0 %v511_v18 }
  0x2d   :  { %91 = vperm.xlu0 %430, %v32_v2  }
  0x30   :  { %v438_v19 = vpop.eup %437  ;;  %427 = vset.pattern.permute.xlu1 %v510_v17 }
  0x31   :  { %v440_v20 = vpop.eup %439  ;;  %316 = vperm.xlu1 %427, %v32_v2   ;;  %v124_v21 = vsub.f32 1.0, %v438_v19  ;;  %v144_v22 = vadd.f32 1e-08, %v438_v19  ;;  %432 = vset.pattern.permute.xlu0 %v510_v17  ;;  %v126_v30 = vmul.f32 %v438_v19, %v438_v19 }
  0x32   :  { %v125_v23 = vsub.f32 1.0, %v440_v20  ;;  %v145_v24 = vadd.f32 1e-08, %v440_v20  ;;  %v127_v32 = vmul.f32 %v440_v20, %v440_v20 }
  0x33   :  { %v130_v25 = vadd.f32 1e-08, %v124_v21  ;;  %441 = vlog2.f32 %v144_v22  ;;  %v140_v28 = vmul.f32 %v124_v21, %v124_v21  ;;  %v128_v40 = vmul.f32 0.75, %v126_v30 }
  0x34   :  { %v131_v26 = vadd.f32 1e-08, %v125_v23  ;;  %443 = vlog2.f32 %v145_v24  ;;  %v141_v29 = vmul.f32 %v125_v23, %v125_v23  ;;  %v129_v43 = vmul.f32 0.75, %v127_v32  ;;  %v35_v24 = vld [vmem:[#allocation2 + $0x8] sm:$0xff] }
  0x35   :  { %445 = vlog2.f32 %v130_v25  ;;  %429 = vset.pattern.permute.xlu1 %v512_v27  ;;  %v142_v34 = vmul.f32 0.25, %v140_v28  ;;  %v48_v21 = vsub.s32 0, %v571_v61 }
  0x36   :  { %447 = vlog2.f32 %v131_v26  ;;  %73 = vperm.xlu1 %429, %v32_v2   ;;  %v143_v37 = vmul.f32 0.25, %v141_v29  ;;  %v305_v2 = vsub.s32 5, %v571_v61 }
  0x38   :  { %v306_v8 = vrot.slane %v577_v3, %v305_v2  ;;  %v83_v2 = vrot.slane %v577_v3, %v82_v58 }
  0x3a   :  { %77 = vperm.xlu1 %429, %v560_v6  }
  0x3e   :  { %431 = vset.pattern.permute.xlu1 %v511_v18 }
  0x3f   :  { %95 = vperm.xlu1 %431, %v560_v6   ;;  %v292_v6 = vrot.slane %v577_v3, %v291_v0 }
  0x40   :  { %v442_v31 = vpop.eup %441 }
  0x41   :  { %v444_v33 = vpop.eup %443  ;;  %v147_v35 = vmul.f32 0.6931472, %v442_v31 }
  0x42   :  { %v446_v36 = vpop.eup %445  ;;  %v149_v38 = vmul.f32 0.6931472, %v444_v33  ;;  %v326_v33 = vrot.slane %v35_v24, %v48_v21 }
  0x43   :  { %v448_v39 = vpop.eup %447  ;;  %v133_v41 = vmul.f32 0.6931472, %v446_v36  ;;  %v150_v42 = vsub.f32 0.0, %v147_v35 }
  0x44   :  { %v135_v44 = vmul.f32 0.6931472, %v448_v39  ;;  %v151_v45 = vsub.f32 0.0, %v149_v38 }
  0x45   :  { %v136_v46 = vsub.f32 0.0, %v133_v41  ;;  %v152_v47 = vmul.f32 %v150_v42, %v142_v34 }
  0x46   :  { %v137_v48 = vsub.f32 0.0, %v135_v44  ;;  %v153_v49 = vmul.f32 %v151_v45, %v143_v37 }
  0x47   :  { %v138_v50 = vmul.f32 %v136_v46, %v128_v40 }
  0x48   :  { %v139_v51 = vmul.f32 %v137_v48, %v129_v43 }
  0x49   :  { %v154_v52 = vsub.f32 %v152_v47, %v138_v50 }
  0x4a   :  { %v155_v53 = vsub.f32 %v153_v49, %v139_v51 }
  0x4b   :  { %402 = vmatprep.mubr.msk.f32.mxu0 %vm159_vm1, %v154_v52 }
  0x4c   :  { %403 = vmatmul.mubr.msk.f32.vlgmr.msra.gmra.mxu0 %vm159_vm1, %v155_v53 }
  0x8b   :  { %v265_v54 = vpop.permute.xlu1 %264  ;;  %v251_v56 = vpop.permute.xlu0 %250 }
  0x8c   :  { %v275_v15 = vmax.f32 %v265_v54, %v274_v5  ;;  %v261_v16 = vmin.f32 %v251_v56, %v260_v7  ;;  %v333_v34 = vmin.f32 %v265_v54, %v274_v5  ;;  %v331_v35 = vmax.f32 %v251_v56, %v260_v7 }
  0x8d   :  { %v64_v54 = vsub.s32 1, %v571_v61  ;;  %v49_v56 = vrot.slane %v577_v3, %v48_v21 }
  0x8e   :  { %v277_v25 = vsub.f32 %v261_v16, %v275_v15  ;;  %v335_v46 = vsub.f32 %v331_v35, %v333_v34 }
  0x8f   :  { %v269_v55 = vpop.permute.xlu1 %268  ;;  %v255_v59 = vpop.permute.xlu0 %254 }
  0x90   :  { %v276_v11 = vmax.f32 %v269_v55, %v274_v5  ;;  %v262_v13 = vmin.f32 %v255_v59, %v260_v7  ;;  %v334_v27 = vmin.f32 %v269_v55, %v274_v5  ;;  %v332_v29 = vmax.f32 %v255_v59, %v260_v7 }
  0x91   :  { %v279_v39 = vmax.f32 %v277_v25, 0.0  ;;  %v100_v5 = vsub.s32 3, %v571_v61 }
  0x92   :  { %v278_v20 = vsub.f32 %v262_v13, %v276_v11  ;;  %v336_v41 = vsub.f32 %v332_v29, %v334_v27 }
  0x94   :  { %v287_v57 = vpop.permute.xlu1 %286  ;;  %v283_v62 = vpop.permute.xlu0 %282  ;;  %v280_v31 = vmax.f32 %v278_v20, 0.0 }
  0x95   :  { %v294_v12 = vmin.f32 %v287_v57, %v292_v6  ;;  %v293_v18 = vmin.f32 %v283_v62, %v292_v6  ;;  %v338_v28 = vmax.f32 %v287_v57, %v292_v6  ;;  %v337_v37 = vmax.f32 %v283_v62, %v292_v6 }
  0x96   :  { %v65_v57 = vrot.slane %v577_v3, %v64_v54 }
  0x99   :  { %v297_v60 = vpop.permute.xlu1 %296  ;;  %v301_v9 = vpop.permute.xlu0 %300 }
  0x9a   :  { %v308_v14 = vmax.f32 %v301_v9, %v306_v8  ;;  %v307_v17 = vmax.f32 %v297_v60, %v306_v8  ;;  %v340_v30 = vmin.f32 %v301_v9, %v306_v8  ;;  %v339_v36 = vmin.f32 %v297_v60, %v306_v8 }
  0x9c   :  { %v310_v22 = vsub.f32 %v294_v12, %v308_v14  ;;  %v309_v26 = vsub.f32 %v293_v18, %v307_v17  ;;  %v342_v42 = vsub.f32 %v338_v28, %v340_v30  ;;  %v341_v47 = vsub.f32 %v337_v37, %v339_v36 }
  0x9e   :  { %v579_v4 = vpop.permute.xlu1 %38  ;;  %v587_v19 = vpop.permute.xlu0 %55  ;;  %v312_v32 = vmax.f32 %v310_v22, 0.0  ;;  %v311_v40 = vmax.f32 %v309_v26, 0.0  ;;  %v344_v50 = vmul.f32 %v342_v42, %v336_v41  ;;  %v343_v52 = vmul.f32 %v341_v47, %v335_v46 }
  0x9f   :  { %v50_v7 = vsub.f32 %v579_v4, %v49_v56  ;;  %v66_v8 = vsub.f32 %v587_v19, %v65_v57 }
  0xa0   :  { %v314_v44 = vmul.f32 %v312_v32, %v280_v31  ;;  %v313_v48 = vmul.f32 %v311_v40, %v279_v39  ;;  %449 = vrcp.f32 %v344_v50 }
  0xa1   :  { %v52_v17 = vand.u32 2147483647, %v50_v7  ;;  %v68_v18 = vand.u32 2147483647, %v66_v8 }
  0xa2   :  { %v585_v10 = vpop.permute.xlu1 %43 }
  0xa3   :  { %v321_v38 = vpop.permute.xlu0 %320  ;;  %v51_v62 = vsub.f32 %v585_v10, %v49_v56  ;;  %v101_v10 = vrot.slane %v577_v3, %v100_v5  ;;  %v70_v27 = vadd.f32 %v68_v18, %v52_v17 }
  0xa4   :  { %v328_v45 = vadd.f32 %v326_v33, %v321_v38 }
  0xa5   :  { %v53_v12 = vand.u32 2147483647, %v51_v62 }
  0xa6   :  { %v330_v51 = vsub.f32 %v328_v45, %v314_v44 }
  0xa7   :  { %v60_v23 = vpop.permute.xlu1 %59 }
  0xa8   :  { %451 = vrcp.f32 %v330_v51  ;;  %v67_v63 = vsub.f32 %v60_v23, %v65_v57  ;;  %v92_v24 = vpop.permute.xlu0 %91  ;;  %v356_v28 = vsub.f32 %v344_v50, %v330_v51 }
  0xa9   :  { %453 = vrcp.f32 %v343_v52  ;;  %v102_v32 = vsub.f32 %v92_v24, %v101_v10 }
  0xaa   :  { %v69_v13 = vand.u32 2147483647, %v67_v63 }
  0xab   :  { %v104_v40 = vand.u32 2147483647, %v102_v32 }
  0xac   :  { %v317_v43 = vpop.permute.xlu1 %316  ;;  %v71_v23 = vadd.f32 %v69_v13, %v53_v12 }
  0xad   :  { %v327_v49 = vadd.f32 %v326_v33, %v317_v43  ;;  %v450_v59 = vpop.eup %449 }
  0xae   :  { %v360_v9 = vmul.f32 %v450_v59, %v344_v50 }
  0xaf   :  { %v329_v53 = vsub.f32 %v327_v49, %v313_v48 }
  0xb0   :  { %v362_v21 = vsub.f32 2.0, %v360_v9 }
  0xb1   :  { %455 = vrcp.f32 %v329_v53  ;;  %v74_v55 = vpop.permute.xlu1 %73  ;;  %v355_v33 = vsub.f32 %v343_v52, %v329_v53 }
  0xb2   :  { %v84_v61 = vsub.f32 %v74_v55, %v83_v2  ;;  %v364_v29 = vmul.f32 %v450_v59, %v362_v21 }
  0xb4   :  { %v86_v31 = vand.u32 2147483647, %v84_v61  ;;  %v366_v38 = vmul.f32 %v364_v29, %v356_v28 }
  0xb5   :  { %v452_v60 = vpop.eup %451  ;;  %v78_v0 = vpop.permute.xlu1 %77 }
  0xb6   :  { %v454_v1 = vpop.eup %453  ;;  %v348_v11 = vmul.f32 %v452_v60, %v330_v51  ;;  %v85_v16 = vsub.f32 %v78_v0, %v83_v2  ;;  %v88_v39 = vadd.f32 %v86_v31, %v70_v27 }
  0xb7   :  { %v359_v14 = vmul.f32 %v454_v1, %v343_v52 }
  0xb8   :  { %v350_v22 = vsub.f32 2.0, %v348_v11  ;;  %v87_v19 = vand.u32 2147483647, %v85_v16  ;;  %v106_v47 = vadd.f32 %v104_v40, %v88_v39 }
  0xb9   :  { %v361_v4 = vsub.f32 2.0, %v359_v14 }
  0xba   :  { %v96_v20 = vpop.permute.xlu1 %95  ;;  %v352_v30 = vmul.f32 %v452_v60, %v350_v22  ;;  %v89_v35 = vadd.f32 %v87_v19, %v71_v23 }
  0xbb   :  { %v103_v26 = vsub.f32 %v96_v20, %v101_v10  ;;  %v363_v34 = vmul.f32 %v454_v1, %v361_v4 }
  0xbc   :  { %v354_v37 = vmul.f32 %v352_v30, %v314_v44 }
  0xbd   :  { %v105_v36 = vand.u32 2147483647, %v103_v26  ;;  %v365_v42 = vmul.f32 %v363_v34, %v355_v33 }
  0xbe   :  { %v456_v6 = vpop.eup %455  ;;  %v368_v46 = vsub.f32 %v354_v37, %v366_v38 }
  0xbf   :  { %v347_v15 = vmul.f32 %v456_v6, %v329_v53  ;;  %v107_v43 = vadd.f32 %v105_v36, %v89_v35 }
  0xc1   :  { %v349_v25 = vsub.f32 2.0, %v347_v15 }
  0xc3   :  { %v351_v3 = vmul.f32 %v456_v6, %v349_v25 }
  0xc5   :  { %v353_v41 = vmul.f32 %v351_v3, %v313_v48 }
  0xc7   :  { %v367_v51 = vsub.f32 %v353_v41, %v365_v42 }
 0x10c   :  { %v404_v45 = vpop.f32.mrf.mxu0 }
 0x10d   :  { %v246_v49 = vadd.f32 %v404_v45, %v107_v43 }
 0x10e   :  { %v236_v50 = vpop.f32.mrf.mxu0 }
 0x10f   :  { %v245_v52 = vadd.f32 %v236_v50, %v106_v47  ;;  %v372_v53 = vsub.f32 %v246_v49, %v368_v46 }
 0x111   :  { %v371_v54 = vsub.f32 %v245_v52, %v367_v51  ;;  %374 = vst [vmem:[#allocation5 + $0x8] sm:$0xff] %v372_v53 }
 0x113   :  { %373 = vst [vmem:[#allocation5] sm:$0xff] %v371_v54 }
 0x114   :  { %488 = shalt.err (!%p485_p9)
}
 0x115   :  { %386 = dma.vmem_to_hbm [thread:$0]  %s381_s1, 256, %s610_s4, [#allocation4], %s502_s18, %s502_s18, %s503_s19  }
 0x116   :  { %499 = dma.done.wait [#allocation4], 256  }
 0x117   :  { %500 = vsyncadd [#allocation4], 4294967040 }
 0x118   :  { %390 = vsyncpa [#allocation3], 1 }
 0x119   :  { %391 = vsyncpa [#allocation4], 1 }

</bundles_post_ra>
